<compile_context>
chip_gen: v7x
topology: tpu7x:2x2x1
jax: 0.10.0
libtpu: 0.0.40
codegen_flags: <defaults>
</compile_context>

<pallas_src>
import jax
import jax.numpy as jnp
from jax import lax
from jax.experimental import pallas as pl
from jax.experimental.pallas import tpu as pltpu

_BN_EPS = 1e-5


# ------------------------------ fused kernel ------------------------------- #

def _decoder_kernel(x_ref, wf_ref, bf_ref, s3_ref, b3_ref,
                    w2_ref, s2_ref, b2_ref, w1_ref, s1_ref, b1_ref, o_ref):
    # x_ref : (1, 49, 10)   latent code, broadcast along the 49 stage-1 pixels
    # wf_ref: (10, 49, 64)  folded (Linear -> view -> deconv3) weight
    # bf_ref: (49, 64)      folded bias
    # s3/b3 : (1, 64)       folded BatchNorm3 scale / bias
    # w2_ref: (64, 128)     deconv2: 4 sub-pixel taps folded along N
    # s2/b2 : (1, 128)      BatchNorm2 scale / bias, tiled over the 4 taps
    # w1_ref: (128, 16)     deconv1: block-diagonal "taps-of-taps" matrix
    # s1/b1 : (1, 16)       BatchNorm1 scale / bias, tiled
    # o_ref : (1, 49, 16)   phase-ordered output pixels

    # Stage 1: bottleneck + first transposed conv as one folded affine map.
    y = bf_ref[...]                                  # (49, 64)
    for k in range(10):                              # 10 column-FMAs on the VPU
        y = y + x_ref[0, :, k:k + 1] * wf_ref[k]
    y = jnp.maximum(y * s3_ref[...] + b3_ref[...], 0.0)          # BN3 + ReLU

    # Stage 2: deconv2 (K=2,s=2) -> one MXU matmul over all 49 pixels, N=128.
    y = jnp.dot(y, w2_ref[...], preferred_element_type=jnp.float32)
    y = jnp.maximum(y * s2_ref[...] + b2_ref[...], 0.0)          # BN2 + ReLU

    # Stage 3: deconv1 (K=2,s=2,Cout=1) -> block-diagonal matmul, N=16.
    y = jnp.dot(y, w1_ref[...], preferred_element_type=jnp.float32)
    y = jnp.maximum(y * s1_ref[...] + b1_ref[...], 0.0)          # BN1 + ReLU

    o_ref[0] = y


# ------------------------- parameter preprocessing -------------------------- #

def _conv_transpose_nchw(x_nchw, wt, stride):
    # ConvTranspose2d(pad=0, bias=False) via dilated conv with flipped weights.
    K = wt.shape[-1]
    rhs = jnp.transpose(wt, (1, 0, 2, 3))[:, :, ::-1, ::-1]      # (Cout,Cin,K,K)
    return lax.conv_general_dilated(
        x_nchw, rhs, window_strides=(1, 1),
        padding=[(K - 1, K - 1), (K - 1, K - 1)],
        lhs_dilation=(stride, stride),
        dimension_numbers=("NCHW", "OIHW", "NCHW"))


def _fold_bn(bn):
    gamma, beta, rmean, rvar = bn
    scale = gamma / jnp.sqrt(rvar + _BN_EPS)
    return scale, beta - rmean * scale


def preprocess_params(params):
    """One-time parameter folding (hoisted out of the forward pass)."""
    lin_w, lin_b = params["lin_w"], params["lin_b"]              # (10,1152),(1152,)
    wt3, wt2, wt1 = params["w3"], params["w2"], params["w1"]

    # Fold Linear -> view -> ConvTranspose2d(128,64,3,s=2): both linear maps,
    # compose into one affine map x(10) -> (49, 64) (rows = 7*h3 + w3).
    wf = _conv_transpose_nchw(lin_w.reshape(10, 128, 3, 3), wt3, 2)   # (10,64,7,7)
    wf = jnp.transpose(wf, (0, 2, 3, 1)).reshape(10, 49, 64)
    bf = _conv_transpose_nchw(lin_b.reshape(1, 128, 3, 3), wt3, 2)    # (1,64,7,7)
    bf = jnp.transpose(bf, (0, 2, 3, 1)).reshape(49, 64)

    s3, b3 = _fold_bn(params["bn3"])                             # (64,)
    s2, b2 = _fold_bn(params["bn2"])                             # (32,)
    s1, b1 = _fold_bn(params["bn1"])                             # (1,)

    # deconv2 (K=s=2): sub-pixel decomposition, 4 taps folded along N:
    #   w2c[ci, 32*(2*kh+kw) + co] = wt2[ci, co, kh, kw]
    w2c = jnp.transpose(wt2, (0, 2, 3, 1)).reshape(64, 128)
    # deconv1 (K=s=2, Cout=1): block-diagonal per layer-2 tap (128 -> 16):
    #   w1bd[32*t2+ci, 4*t2 + (2*kh+kw)] = wt1[ci, 0, kh, kw]
    w1m = wt1[:, 0, :, :].reshape(32, 4)
    w1bd = jnp.kron(jnp.eye(4, dtype=wt1.dtype), w1m)            # (128, 16)

    return dict(
        wf=wf, bf=bf,
        s3=s3.reshape(1, 64), b3=b3.reshape(1, 64),
        w2=w2c,
        s2=jnp.tile(s2, 4).reshape(1, 128), b2=jnp.tile(b2, 4).reshape(1, 128),
        w1=w1bd,
        s1=jnp.tile(s1, 16).reshape(1, 16), b1=jnp.tile(b1, 16).reshape(1, 16),
    )


# --------------------------------- forward ---------------------------------- #

@jax.jit
def decoder_forward(x, pre):
    B = x.shape[0]
    xb = jnp.broadcast_to(x.astype(jnp.float32)[:, None, :], (B, 49, 10))

    def _full(a):
        return pl.BlockSpec(a.shape, lambda b: (0,) * a.ndim)

    out = pl.pallas_call(
        _decoder_kernel,
        out_shape=jax.ShapeDtypeStruct((B, 49, 16), jnp.float32),
        grid=(B,),
        in_specs=[
            pl.BlockSpec((1, 49, 10), lambda b: (b, 0, 0)),
            _full(pre["wf"]), _full(pre["bf"]),
            _full(pre["s3"]), _full(pre["b3"]),
            _full(pre["w2"]), _full(pre["s2"]), _full(pre["b2"]),
            _full(pre["w1"]), _full(pre["s1"]), _full(pre["b1"]),
        ],
        out_specs=pl.BlockSpec((1, 49, 16), lambda b: (b, 0, 0)),
        compiler_params=pltpu.CompilerParams(
            dimension_semantics=("parallel",)),
    )(xb, pre["wf"], pre["bf"], pre["s3"], pre["b3"],
      pre["w2"], pre["s2"], pre["b2"], pre["w1"], pre["s1"], pre["b1"])

    # Un-shuffle the sub-pixel phases:
    # out[b, 7*h3+w3, 8*kh2+4*kw2+2*kh1+kw1] -> y[b,0, 4*h3+2*kh2+kh1, 4*w3+2*kw2+kw1]
    y = out.reshape(B, 7, 7, 2, 2, 2, 2)
    y = jnp.transpose(y, (0, 1, 3, 5, 2, 4, 6))
    return y.reshape(B, 1, 28, 28)


# --------------------------- pure-JAX reference ----------------------------- #

def decoder_reference(x, params):
    h = x @ params["lin_w"] + params["lin_b"]
    B = h.shape[0]
    h = h.reshape(B, 128, 3, 3)
    for wt, bn in [(params["w3"], params["bn3"]),
                   (params["w2"], params["bn2"]),
                   (params["w1"], params["bn1"])]:
        gamma, beta, rmean, rvar = bn
        h = _conv_transpose_nchw(h, wt, 2)
        scale = gamma / jnp.sqrt(rvar + _BN_EPS)
        bias = beta - rmean * scale
        h = jnp.maximum(h * scale[None, :, None, None]
                        + bias[None, :, None, None], 0.0)
    return h


# ---------------------------------- main ------------------------------------ #

if __name__ == "__main__":
    key = jax.random.PRNGKey(0)
    ks = jax.random.split(key, 10)
    B = 2

    def bn_params(k, c):
        kg, kb, km, kv = jax.random.split(k, 4)
        gamma = 1.0 + 0.1 * jax.random.normal(kg, (c,), jnp.float32)
        beta = 0.1 * jax.random.normal(kb, (c,), jnp.float32)
        rmean = 0.1 * jax.random.normal(km, (c,), jnp.float32)
        rvar = 0.5 + jax.random.uniform(kv, (c,), jnp.float32)
        return (gamma, beta, rmean, rvar)

    params = {
        "lin_w": 0.1 * jax.random.normal(ks[0], (10, 1152), jnp.float32),
        "lin_b": 0.1 * jax.random.normal(ks[1], (1152,), jnp.float32),
        "w3": 0.05 * jax.random.normal(ks[2], (128, 64, 3, 3), jnp.float32),
        "w2": 0.05 * jax.random.normal(ks[3], (64, 32, 2, 2), jnp.float32),
        "w1": 0.05 * jax.random.normal(ks[4], (32, 1, 2, 2), jnp.float32),
        "bn3": bn_params(ks[5], 64),
        "bn2": bn_params(ks[6], 32),
        "bn1": bn_params(ks[7], 1),
    }

    x = jax.random.normal(ks[8], (B, 10), jnp.float32)

    pre = preprocess_params(params)          # one-time parameter folding
    out = jax.block_until_ready(decoder_forward(x, pre))
    assert out.shape == (B, 1, 28, 28), out.shape

    ref = jax.block_until_ready(decoder_reference(x, params))
    max_err = float(jnp.max(jnp.abs(out - ref)))
    assert max_err < 1e-3, f"mismatch vs reference: {max_err}"

    print("KERNEL_OK")
</pallas_src>

<mosaic_0001>
module attributes {stable_mosaic.version = 11 : i64} {
  func.func @_decoder_kernel(%arg0: i32, %arg1: memref<1x49x10xf32, #tpu.memory_space<vmem>>, %arg2: memref<10x49x64xf32, #tpu.memory_space<vmem>>, %arg3: memref<49x64xf32, #tpu.memory_space<vmem>>, %arg4: memref<1x64xf32, #tpu.memory_space<vmem>>, %arg5: memref<1x64xf32, #tpu.memory_space<vmem>>, %arg6: memref<64x128xf32, #tpu.memory_space<vmem>>, %arg7: memref<1x128xf32, #tpu.memory_space<vmem>>, %arg8: memref<1x128xf32, #tpu.memory_space<vmem>>, %arg9: memref<128x16xf32, #tpu.memory_space<vmem>>, %arg10: memref<1x16xf32, #tpu.memory_space<vmem>>, %arg11: memref<1x16xf32, #tpu.memory_space<vmem>>, %arg12: memref<1x49x16xf32, #tpu.memory_space<vmem>>) attributes {dimension_semantics = [#tpu.dimension_semantics<parallel>], iteration_bounds = array<i64: 2>, scalar_prefetch = 0 : i64, scratch_operands = 0 : i64, tpu.core_type = #tpu.core_type<tc>, window_params = [{transform_indices = @transform_0, window_bounds = array<i64: 1, 49, 10>}, {pipeline_mode = #tpu.pipeline_mode<synchronous>, transform_indices = @transform_1, window_bounds = array<i64: 10, 49, 64>}, {pipeline_mode = #tpu.pipeline_mode<synchronous>, transform_indices = @transform_2, window_bounds = array<i64: 49, 64>}, {pipeline_mode = #tpu.pipeline_mode<synchronous>, transform_indices = @transform_3, window_bounds = array<i64: 1, 64>}, {pipeline_mode = #tpu.pipeline_mode<synchronous>, transform_indices = @transform_4, window_bounds = array<i64: 1, 64>}, {pipeline_mode = #tpu.pipeline_mode<synchronous>, transform_indices = @transform_5, window_bounds = array<i64: 64, 128>}, {pipeline_mode = #tpu.pipeline_mode<synchronous>, transform_indices = @transform_6, window_bounds = array<i64: 1, 128>}, {pipeline_mode = #tpu.pipeline_mode<synchronous>, transform_indices = @transform_7, window_bounds = array<i64: 1, 128>}, {pipeline_mode = #tpu.pipeline_mode<synchronous>, transform_indices = @transform_8, window_bounds = array<i64: 128, 16>}, {pipeline_mode = #tpu.pipeline_mode<synchronous>, transform_indices = @transform_9, window_bounds = array<i64: 1, 16>}, {pipeline_mode = #tpu.pipeline_mode<synchronous>, transform_indices = @transform_10, window_bounds = array<i64: 1, 16>}, {transform_indices = @transform_11, window_bounds = array<i64: 1, 49, 16>}]} {
    %c0 = arith.constant 0 : index
    %c0_0 = arith.constant 0 : index
    %0 = vector.load %arg3[%c0, %c0_0] : memref<49x64xf32, #tpu.memory_space<vmem>>, vector<49x64xf32>
    %c0_1 = arith.constant 0 : index
    %c0_2 = arith.constant 0 : index
    %c0_3 = arith.constant 0 : index
    %1 = vector.load %arg1[%c0_1, %c0_2, %c0_3] : memref<1x49x10xf32, #tpu.memory_space<vmem>>, vector<1x49x1xf32>
    %2 = vector.shape_cast %1 : vector<1x49x1xf32> to vector<49x1xf32>
    %c0_4 = arith.constant 0 : index
    %c0_5 = arith.constant 0 : index
    %c0_6 = arith.constant 0 : index
    %3 = vector.load %arg2[%c0_4, %c0_5, %c0_6] : memref<10x49x64xf32, #tpu.memory_space<vmem>>, vector<1x49x64xf32>
    %4 = vector.shape_cast %3 : vector<1x49x64xf32> to vector<49x64xf32>
    %5 = vector.broadcast %2 : vector<49x1xf32> to vector<49x64xf32>
    %6 = arith.mulf %5, %4 : vector<49x64xf32>
    %7 = arith.addf %0, %6 : vector<49x64xf32>
    %c0_7 = arith.constant 0 : index
    %c0_8 = arith.constant 0 : index
    %c1 = arith.constant 1 : index
    %8 = vector.load %arg1[%c0_7, %c0_8, %c1] : memref<1x49x10xf32, #tpu.memory_space<vmem>>, vector<1x49x1xf32>
    %9 = vector.shape_cast %8 : vector<1x49x1xf32> to vector<49x1xf32>
    %c1_9 = arith.constant 1 : index
    %c0_10 = arith.constant 0 : index
    %c0_11 = arith.constant 0 : index
    %10 = vector.load %arg2[%c1_9, %c0_10, %c0_11] : memref<10x49x64xf32, #tpu.memory_space<vmem>>, vector<1x49x64xf32>
    %11 = vector.shape_cast %10 : vector<1x49x64xf32> to vector<49x64xf32>
    %12 = vector.broadcast %9 : vector<49x1xf32> to vector<49x64xf32>
    %13 = arith.mulf %12, %11 : vector<49x64xf32>
    %14 = arith.addf %7, %13 : vector<49x64xf32>
    %c0_12 = arith.constant 0 : index
    %c0_13 = arith.constant 0 : index
    %c2 = arith.constant 2 : index
    %15 = vector.load %arg1[%c0_12, %c0_13, %c2] : memref<1x49x10xf32, #tpu.memory_space<vmem>>, vector<1x49x1xf32>
    %16 = vector.shape_cast %15 : vector<1x49x1xf32> to vector<49x1xf32>
    %c2_14 = arith.constant 2 : index
    %c0_15 = arith.constant 0 : index
    %c0_16 = arith.constant 0 : index
    %17 = vector.load %arg2[%c2_14, %c0_15, %c0_16] : memref<10x49x64xf32, #tpu.memory_space<vmem>>, vector<1x49x64xf32>
    %18 = vector.shape_cast %17 : vector<1x49x64xf32> to vector<49x64xf32>
    %19 = vector.broadcast %16 : vector<49x1xf32> to vector<49x64xf32>
    %20 = arith.mulf %19, %18 : vector<49x64xf32>
    %21 = arith.addf %14, %20 : vector<49x64xf32>
    %c0_17 = arith.constant 0 : index
    %c0_18 = arith.constant 0 : index
    %c3 = arith.constant 3 : index
    %22 = vector.load %arg1[%c0_17, %c0_18, %c3] : memref<1x49x10xf32, #tpu.memory_space<vmem>>, vector<1x49x1xf32>
    %23 = vector.shape_cast %22 : vector<1x49x1xf32> to vector<49x1xf32>
    %c3_19 = arith.constant 3 : index
    %c0_20 = arith.constant 0 : index
    %c0_21 = arith.constant 0 : index
    %24 = vector.load %arg2[%c3_19, %c0_20, %c0_21] : memref<10x49x64xf32, #tpu.memory_space<vmem>>, vector<1x49x64xf32>
    %25 = vector.shape_cast %24 : vector<1x49x64xf32> to vector<49x64xf32>
    %26 = vector.broadcast %23 : vector<49x1xf32> to vector<49x64xf32>
    %27 = arith.mulf %26, %25 : vector<49x64xf32>
    %28 = arith.addf %21, %27 : vector<49x64xf32>
    %c0_22 = arith.constant 0 : index
    %c0_23 = arith.constant 0 : index
    %c4 = arith.constant 4 : index
    %29 = vector.load %arg1[%c0_22, %c0_23, %c4] : memref<1x49x10xf32, #tpu.memory_space<vmem>>, vector<1x49x1xf32>
    %30 = vector.shape_cast %29 : vector<1x49x1xf32> to vector<49x1xf32>
    %c4_24 = arith.constant 4 : index
    %c0_25 = arith.constant 0 : index
    %c0_26 = arith.constant 0 : index
    %31 = vector.load %arg2[%c4_24, %c0_25, %c0_26] : memref<10x49x64xf32, #tpu.memory_space<vmem>>, vector<1x49x64xf32>
    %32 = vector.shape_cast %31 : vector<1x49x64xf32> to vector<49x64xf32>
    %33 = vector.broadcast %30 : vector<49x1xf32> to vector<49x64xf32>
    %34 = arith.mulf %33, %32 : vector<49x64xf32>
    %35 = arith.addf %28, %34 : vector<49x64xf32>
    %c0_27 = arith.constant 0 : index
    %c0_28 = arith.constant 0 : index
    %c5 = arith.constant 5 : index
    %36 = vector.load %arg1[%c0_27, %c0_28, %c5] : memref<1x49x10xf32, #tpu.memory_space<vmem>>, vector<1x49x1xf32>
    %37 = vector.shape_cast %36 : vector<1x49x1xf32> to vector<49x1xf32>
    %c5_29 = arith.constant 5 : index
    %c0_30 = arith.constant 0 : index
    %c0_31 = arith.constant 0 : index
    %38 = vector.load %arg2[%c5_29, %c0_30, %c0_31] : memref<10x49x64xf32, #tpu.memory_space<vmem>>, vector<1x49x64xf32>
    %39 = vector.shape_cast %38 : vector<1x49x64xf32> to vector<49x64xf32>
    %40 = vector.broadcast %37 : vector<49x1xf32> to vector<49x64xf32>
    %41 = arith.mulf %40, %39 : vector<49x64xf32>
    %42 = arith.addf %35, %41 : vector<49x64xf32>
    %c0_32 = arith.constant 0 : index
    %c0_33 = arith.constant 0 : index
    %c6 = arith.constant 6 : index
    %43 = vector.load %arg1[%c0_32, %c0_33, %c6] : memref<1x49x10xf32, #tpu.memory_space<vmem>>, vector<1x49x1xf32>
    %44 = vector.shape_cast %43 : vector<1x49x1xf32> to vector<49x1xf32>
    %c6_34 = arith.constant 6 : index
    %c0_35 = arith.constant 0 : index
    %c0_36 = arith.constant 0 : index
    %45 = vector.load %arg2[%c6_34, %c0_35, %c0_36] : memref<10x49x64xf32, #tpu.memory_space<vmem>>, vector<1x49x64xf32>
    %46 = vector.shape_cast %45 : vector<1x49x64xf32> to vector<49x64xf32>
    %47 = vector.broadcast %44 : vector<49x1xf32> to vector<49x64xf32>
    %48 = arith.mulf %47, %46 : vector<49x64xf32>
    %49 = arith.addf %42, %48 : vector<49x64xf32>
    %c0_37 = arith.constant 0 : index
    %c0_38 = arith.constant 0 : index
    %c7 = arith.constant 7 : index
    %50 = vector.load %arg1[%c0_37, %c0_38, %c7] : memref<1x49x10xf32, #tpu.memory_space<vmem>>, vector<1x49x1xf32>
    %51 = vector.shape_cast %50 : vector<1x49x1xf32> to vector<49x1xf32>
    %c7_39 = arith.constant 7 : index
    %c0_40 = arith.constant 0 : index
    %c0_41 = arith.constant 0 : index
    %52 = vector.load %arg2[%c7_39, %c0_40, %c0_41] : memref<10x49x64xf32, #tpu.memory_space<vmem>>, vector<1x49x64xf32>
    %53 = vector.shape_cast %52 : vector<1x49x64xf32> to vector<49x64xf32>
    %54 = vector.broadcast %51 : vector<49x1xf32> to vector<49x64xf32>
    %55 = arith.mulf %54, %53 : vector<49x64xf32>
    %56 = arith.addf %49, %55 : vector<49x64xf32>
    %c0_42 = arith.constant 0 : index
    %c0_43 = arith.constant 0 : index
    %c8 = arith.constant 8 : index
    %57 = vector.load %arg1[%c0_42, %c0_43, %c8] : memref<1x49x10xf32, #tpu.memory_space<vmem>>, vector<1x49x1xf32>
    %58 = vector.shape_cast %57 : vector<1x49x1xf32> to vector<49x1xf32>
    %c8_44 = arith.constant 8 : index
    %c0_45 = arith.constant 0 : index
    %c0_46 = arith.constant 0 : index
    %59 = vector.load %arg2[%c8_44, %c0_45, %c0_46] : memref<10x49x64xf32, #tpu.memory_space<vmem>>, vector<1x49x64xf32>
    %60 = vector.shape_cast %59 : vector<1x49x64xf32> to vector<49x64xf32>
    %61 = vector.broadcast %58 : vector<49x1xf32> to vector<49x64xf32>
    %62 = arith.mulf %61, %60 : vector<49x64xf32>
    %63 = arith.addf %56, %62 : vector<49x64xf32>
    %c0_47 = arith.constant 0 : index
    %c0_48 = arith.constant 0 : index
    %c9 = arith.constant 9 : index
    %64 = vector.load %arg1[%c0_47, %c0_48, %c9] : memref<1x49x10xf32, #tpu.memory_space<vmem>>, vector<1x49x1xf32>
    %65 = vector.shape_cast %64 : vector<1x49x1xf32> to vector<49x1xf32>
    %c9_49 = arith.constant 9 : index
    %c0_50 = arith.constant 0 : index
    %c0_51 = arith.constant 0 : index
    %66 = vector.load %arg2[%c9_49, %c0_50, %c0_51] : memref<10x49x64xf32, #tpu.memory_space<vmem>>, vector<1x49x64xf32>
    %67 = vector.shape_cast %66 : vector<1x49x64xf32> to vector<49x64xf32>
    %68 = vector.broadcast %65 : vector<49x1xf32> to vector<49x64xf32>
    %69 = arith.mulf %68, %67 : vector<49x64xf32>
    %70 = arith.addf %63, %69 : vector<49x64xf32>
    %c0_52 = arith.constant 0 : index
    %c0_53 = arith.constant 0 : index
    %71 = vector.load %arg4[%c0_52, %c0_53] : memref<1x64xf32, #tpu.memory_space<vmem>>, vector<1x64xf32>
    %72 = vector.broadcast %71 : vector<1x64xf32> to vector<49x64xf32>
    %73 = arith.mulf %70, %72 : vector<49x64xf32>
    %c0_54 = arith.constant 0 : index
    %c0_55 = arith.constant 0 : index
    %74 = vector.load %arg5[%c0_54, %c0_55] : memref<1x64xf32, #tpu.memory_space<vmem>>, vector<1x64xf32>
    %75 = vector.broadcast %74 : vector<1x64xf32> to vector<49x64xf32>
    %76 = arith.addf %73, %75 : vector<49x64xf32>
    %cst = arith.constant 0.000000e+00 : f32
    %77 = vector.broadcast %cst : f32 to vector<49x64xf32>
    %78 = arith.maximumf %76, %77 : vector<49x64xf32>
    %c0_56 = arith.constant 0 : index
    %c0_57 = arith.constant 0 : index
    %79 = vector.load %arg6[%c0_56, %c0_57] : memref<64x128xf32, #tpu.memory_space<vmem>>, vector<64x128xf32>
    %cst_58 = arith.constant dense<0.000000e+00> : vector<49x128xf32>
    %80 = tpu.matmul %78, %79, %cst_58 {dimension_numbers = #tpu.dot_dimension_numbers<[1], [0], [0], [1], [0, 0, 1, 1], [], []>} : vector<49x64xf32>, vector<64x128xf32>, vector<49x128xf32> -> vector<49x128xf32>
    %c0_59 = arith.constant 0 : index
    %c0_60 = arith.constant 0 : index
    %81 = vector.load %arg7[%c0_59, %c0_60] : memref<1x128xf32, #tpu.memory_space<vmem>>, vector<1x128xf32>
    %82 = vector.broadcast %81 : vector<1x128xf32> to vector<49x128xf32>
    %83 = arith.mulf %80, %82 : vector<49x128xf32>
    %c0_61 = arith.constant 0 : index
    %c0_62 = arith.constant 0 : index
    %84 = vector.load %arg8[%c0_61, %c0_62] : memref<1x128xf32, #tpu.memory_space<vmem>>, vector<1x128xf32>
    %85 = vector.broadcast %84 : vector<1x128xf32> to vector<49x128xf32>
    %86 = arith.addf %83, %85 : vector<49x128xf32>
    %cst_63 = arith.constant 0.000000e+00 : f32
    %87 = vector.broadcast %cst_63 : f32 to vector<49x128xf32>
    %88 = arith.maximumf %86, %87 : vector<49x128xf32>
    %c0_64 = arith.constant 0 : index
    %c0_65 = arith.constant 0 : index
    %89 = vector.load %arg9[%c0_64, %c0_65] : memref<128x16xf32, #tpu.memory_space<vmem>>, vector<128x16xf32>
    %cst_66 = arith.constant dense<0.000000e+00> : vector<49x16xf32>
    %90 = tpu.matmul %88, %89, %cst_66 {dimension_numbers = #tpu.dot_dimension_numbers<[1], [0], [0], [1], [0, 0, 1, 1], [], []>} : vector<49x128xf32>, vector<128x16xf32>, vector<49x16xf32> -> vector<49x16xf32>
    %c0_67 = arith.constant 0 : index
    %c0_68 = arith.constant 0 : index
    %91 = vector.load %arg10[%c0_67, %c0_68] : memref<1x16xf32, #tpu.memory_space<vmem>>, vector<1x16xf32>
    %92 = vector.broadcast %91 : vector<1x16xf32> to vector<49x16xf32>
    %93 = arith.mulf %90, %92 : vector<49x16xf32>
    %c0_69 = arith.constant 0 : index
    %c0_70 = arith.constant 0 : index
    %94 = vector.load %arg11[%c0_69, %c0_70] : memref<1x16xf32, #tpu.memory_space<vmem>>, vector<1x16xf32>
    %95 = vector.broadcast %94 : vector<1x16xf32> to vector<49x16xf32>
    %96 = arith.addf %93, %95 : vector<49x16xf32>
    %cst_71 = arith.constant 0.000000e+00 : f32
    %97 = vector.broadcast %cst_71 : f32 to vector<49x16xf32>
    %98 = arith.maximumf %96, %97 : vector<49x16xf32>
    %c0_72 = arith.constant 0 : index
    %c0_73 = arith.constant 0 : index
    %c0_74 = arith.constant 0 : index
    %99 = vector.load %arg12[%c0_72, %c0_73, %c0_74] : memref<1x49x16xf32, #tpu.memory_space<vmem>>, vector<1x49x16xf32>
    %100 = vector.shape_cast %99 : vector<1x49x16xf32> to vector<49x16xf32>
    %101 = vector.shape_cast %98 : vector<49x16xf32> to vector<1x49x16xf32>
    tpu.vector_store %arg12[%c0_72, %c0_73, %c0_74], %101 {strides = array<i32>} : memref<1x49x16xf32, #tpu.memory_space<vmem>>, vector<1x49x16xf32>,
    return
  }
  func.func @transform_0(%arg0: i32) -> (i32, i32, i32) {
    %c0_i32 = arith.constant 0 : i32
    %c0_i32_0 = arith.constant 0 : i32
    %c0_i32_1 = arith.constant 0 : i32
    return %arg0, %c0_i32, %c0_i32_0 : i32, i32, i32
  }
  func.func @transform_1(%arg0: i32) -> (i32, i32, i32) {
    %c0_i32 = arith.constant 0 : i32
    %c0_i32_0 = arith.constant 0 : i32
    %c0_i32_1 = arith.constant 0 : i32
    %c0_i32_2 = arith.constant 0 : i32
    return %c0_i32, %c0_i32_0, %c0_i32_1 : i32, i32, i32
  }
  func.func @transform_2(%arg0: i32) -> (i32, i32) {
    %c0_i32 = arith.constant 0 : i32
    %c0_i32_0 = arith.constant 0 : i32
    %c0_i32_1 = arith.constant 0 : i32
    return %c0_i32, %c0_i32_0 : i32, i32
  }
  func.func @transform_3(%arg0: i32) -> (i32, i32) {
    %c0_i32 = arith.constant 0 : i32
    %c0_i32_0 = arith.constant 0 : i32
    %c0_i32_1 = arith.constant 0 : i32
    return %c0_i32, %c0_i32_0 : i32, i32
  }
  func.func @transform_4(%arg0: i32) -> (i32, i32) {
    %c0_i32 = arith.constant 0 : i32
    %c0_i32_0 = arith.constant 0 : i32
    %c0_i32_1 = arith.constant 0 : i32
    return %c0_i32, %c0_i32_0 : i32, i32
  }
  func.func @transform_5(%arg0: i32) -> (i32, i32) {
    %c0_i32 = arith.constant 0 : i32
    %c0_i32_0 = arith.constant 0 : i32
    %c0_i32_1 = arith.constant 0 : i32
    return %c0_i32, %c0_i32_0 : i32, i32
  }
  func.func @transform_6(%arg0: i32) -> (i32, i32) {
    %c0_i32 = arith.constant 0 : i32
    %c0_i32_0 = arith.constant 0 : i32
    %c0_i32_1 = arith.constant 0 : i32
    return %c0_i32, %c0_i32_0 : i32, i32
  }
  func.func @transform_7(%arg0: i32) -> (i32, i32) {
    %c0_i32 = arith.constant 0 : i32
    %c0_i32_0 = arith.constant 0 : i32
    %c0_i32_1 = arith.constant 0 : i32
    return %c0_i32, %c0_i32_0 : i32, i32
  }
  func.func @transform_8(%arg0: i32) -> (i32, i32) {
    %c0_i32 = arith.constant 0 : i32
    %c0_i32_0 = arith.constant 0 : i32
    %c0_i32_1 = arith.constant 0 : i32
    return %c0_i32, %c0_i32_0 : i32, i32
  }
  func.func @transform_9(%arg0: i32) -> (i32, i32) {
    %c0_i32 = arith.constant 0 : i32
    %c0_i32_0 = arith.constant 0 : i32
    %c0_i32_1 = arith.constant 0 : i32
    return %c0_i32, %c0_i32_0 : i32, i32
  }
  func.func @transform_10(%arg0: i32) -> (i32, i32) {
    %c0_i32 = arith.constant 0 : i32
    %c0_i32_0 = arith.constant 0 : i32
    %c0_i32_1 = arith.constant 0 : i32
    return %c0_i32, %c0_i32_0 : i32, i32
  }
  func.func @transform_11(%arg0: i32) -> (i32, i32, i32) {
    %c0_i32 = arith.constant 0 : i32
    %c0_i32_0 = arith.constant 0 : i32
    %c0_i32_1 = arith.constant 0 : i32
    return %arg0, %c0_i32, %c0_i32_0 : i32, i32, i32
  }
}

</mosaic_0001>

<bundles_post_ra>
// kernel: decoder_forward.1
= control target key start
LH: loop header
LB: loop body
LE: loop exit
PB: predicated region body
PF: predicated region fallthrough
CT: control target
= control target key end

     0   :  { %16 = vsyncpa [#allocation3], 0  ;;  %s1761_s17 = smov 0   ;;  %s2245_s0 = inlined_call_operand.vmem [shape: f32[2,49,10], index: 0, kind: input, shape index: {}]   ;;  %s2246_s1 = inlined_call_operand.hbm [shape: f32[10,49,64], index: 1, kind: input, shape index: {}]   ;;  %s2247_s2 = inlined_call_operand.vmem [shape: f32[49,64], index: 2, kind: input, shape index: {}]   ;;  %s2248_s3 = inlined_call_operand.vmem [shape: f32[1,64], index: 3, kind: input, shape index: {}]   ;;  %s2249_s4 = inlined_call_operand.vmem [shape: f32[1,64], index: 4, kind: input, shape index: {}]   ;;  %s2250_s5 = inlined_call_operand.vmem [shape: f32[64,128], index: 5, kind: input, shape index: {}]   ;;  %s2251_s6 = inlined_call_operand.vmem [shape: f32[1,128], index: 6, kind: input, shape index: {}]   ;;  %s2252_s7 = inlined_call_operand.vmem [shape: f32[1,128], index: 7, kind: input, shape index: {}]   ;;  %s2253_s8 = inlined_call_operand.vmem [shape: f32[128,16], index: 8, kind: input, shape index: {}]   ;;  %s2254_s9 = inlined_call_operand.vmem [shape: f32[1,16], index: 9, kind: input, shape index: {}]   ;;  %s2255_s10 = inlined_call_operand.vmem [shape: f32[1,16], index: 10, kind: input, shape index: {}]   ;;  %s2256_s11 = inlined_call_operand.vmem [shape: f32[2,49,16], index: 11, kind: output, shape index: {}]  }
   0x1 LB: > { %s1767_s18 = sadd.s32 4294967295, %s1683_s17   ;;  %p1351_p0 = scmp.ge.s32.totalorder %s1683_s17, 1  ;;  %s1683_s17 = sphi %s1761_s17, %s22_s17  }
   0x2   : > { %p289_p1 = scmp.lt.s32.totalorder %s1683_s17, 3  ;;  %s1685_s19 = smov [#allocation2]  }
   0x3   : > { %s301_s20 = sshll.u32 %s1685_s19, 4  ;;  %p2257_p3 = scmp.eq.s32.totalorder %s1767_s18, 0  ;;  %s302_s20 = int_to_ptr.vmem [resolvable:$true] %s301_s20 }
   0x4   : > { %p1771_p2 = pnand %p1351_p0, %p289_p1  ;;  %s1645_s25 = scalar_lea.hbm %s2246_s1, 8960 }
   0x5   : > { %p1646_p6 = scmp.ne.s32.totalorder %s2246_s1, %s1645_s25  ;;  %p1652_p10 = scmp.lt.u32.totalorder %s1645_s25, %s2246_s1 }
   0x6   : > { %s2259_s21 = scalar_select %p1771_p2, 1, 0 }
   0x7   : > { %p1558_p4 = pneg %p1771_p2 }
   0x9   : > { %p1780_p5 = pnand %p2257_p3, %p1558_p4 }
   0xb   : > { %p1647_p7 = pneg %p1780_p5 }
   0xd   : > { %p1648_p8 = pnand %p1647_p7, %p1646_p6 }
   0xf   : > { %p1649_p9 = pneg %p1648_p8 }
  0x11   : > { %p1654_p11 = pnand %p1652_p10, %p1649_p9 }
  0x13   : > { %1657 = shalt.err (!%p1654_p11)
}
  0x14   : > { %s1658_s30 = scalar_lea.vmem %s302_s20, 8960  ;;  %p1666_p1 = scmp.lt.s32.totalorder %s302_s20, %s302_s20 }
  0x15   : > { %p1659_p12 = scmp.ne.s32.totalorder %s302_s20, %s1658_s30  ;;  %p1667_p4 = scmp.lt.s32.totalorder %s1658_s30, %s1658_s30 }
  0x17   : > { %p1661_p13 = pnand %p1659_p12, %p1647_p7  ;;  %p1668_p3 = por %p1667_p4, %p1666_p1 }
  0x19   : > { %p1662_p0 = pneg %p1661_p13 }
  0x1b   : > { %p1669_p2 = pnand %p1668_p3, %p1662_p0 }
  0x1d   : > { %1672 = shalt.err (!%p1669_p2)
}
  0x1e   : > { %s1686_s12 = smov 128   ;;  %s1687_s13 = smov 8  }
  0x1f   : > { %1561 = dma.hbm_to_vmem [thread:$0]  (!%p1780_p5), %s2246_s1, 8960, %s302_s20, [#allocation3], %s1686_s12, %s1686_s12, %s1687_s13  }
  0x20   : > { %p2261_p6 = scmp.ne.s32.totalorder %s2259_s21, 0 }
  0x21   : > { %p2262_p8 = scmp.eq.s32.totalorder (!%p2261_p6), %s1767_s18, 0 }
  0x22   : > { %352 = sbr.rel (%p2261_p6) target bundleno = 848 (0x350), region = 64 }
  0x29   : > { %1678 = dma.done.wait (%p2262_p8), [#allocation3], 8960   ;;  %p2263_p7 = pmov %p2262_p8 }
  0x2a   : > { %p392_p2 = scmp.lt.s32.totalorder %s1767_s18, 1  ;;  %v1688_v0 = vmov 0   ;;  %v1689_v4 = vmov 2   ;;  %v1690_v5 = vmov 3   ;;  %v1691_v6 = vmov 1   ;;  %v957_v17 = vld [vmem:[%s2250_s5] sm:$0xff] }
  0x2b   : > { %1680 = vsyncadd (%p2263_p7), [#allocation3], 4294958336  ;;  %1589 = vset.pattern.permute.xlu1 %v1688_v0  ;;  %1588 = vset.pattern.permute.xlu0 %v1688_v0  ;;  %v1692_v9 = vmov 9   ;;  %v1693_v10 = vmov 4   ;;  %v1694_v12 = vmov 6   ;;  %v1695_v13 = vmov 5  }
  0x2c   : > { %s2265_s18 = smov (!%p392_p2, %s1767_s18), 1  ;;  %v1696_v14 = vmov 7   ;;  %v1697_v16 = vmov 8   ;;  %v958_v18 = vld [vmem:[%s2250_s5 + $0x8] sm:$0xff]  ;;  %v1698_v19 = vmov 0.0|0.0   ;;  %v959_v21 = vld [vmem:[%s2250_s5 + $0x10] sm:$0xff] }
  0x2d   : > { %s1553_s16 = smul.u32 56, %s2265_s18  ;;  %1501 = vmatprep.subr.bf16.mxu0 %v1698_v19  ;;  %v1502_v20 = vpack.c.bf16 %v958_v18, %v957_v17  ;;  %1537 = vmatprep.subr.bf16.mxu1 %v1698_v19  ;;  %v960_v22 = vld [vmem:[%s2250_s5 + $0x18] sm:$0xff]  ;;  %v961_v24 = vld [vmem:[%s2250_s5 + $0x20] sm:$0xff]  ;;  %v962_v25 = vld [vmem:[%s2250_s5 + $0x28] sm:$0xff]  ;;  %vm1699_vm0 = vmmov 0   ;;  %v1700_v30 = vmov 0.0  }
  0x2e   : > { %v1505_v23 = vpack.c.bf16 %v960_v22, %v959_v21  ;;  %v1508_v26 = vpack.c.bf16 %v962_v25, %v961_v24  ;;  %v963_v27 = vld [vmem:[%s2250_s5 + $0x30] sm:$0xff]  ;;  %v964_v28 = vld [vmem:[%s2250_s5 + $0x38] sm:$0xff]  ;;  %1427 = vmatprep.mubr.msk.f32.mxu0 %vm1699_vm0, %v1700_v30  ;;  %1483 = vmatprep.mubr.msk.f32.mxu1 %vm1699_vm0, %v1700_v30  ;;  %v417_v33 = vld [vmem:[#allocation2 + $0x8] sm:$0xff]  ;;  %vm965_vm1 = vcmask 523264   ;;  %vm1273_vm2 = vcmask 130048  }
  0x2f   : > { %s1818_s21 = scalar_lea.vmem %s2245_s0, %s1553_s16  ;;  %1503 = vmatpush3.bf16.msra.mxu0 %v1502_v20  ;;  %v1511_v29 = vpack.c.bf16 %v964_v28, %v963_v27  ;;  %v403_v37 = vld [vmem:[%s2247_s2 + $0x8] sm:$0xff]  ;;  %v474_v38 = vld [vmem:[#allocation2 + $0x40] sm:$0xff]  ;;  %v524_v47 = vld [vmem:[#allocation2 + $0x78] sm:$0xff]  ;;  %s2227_s15 = scalar_lea.vmem %s2256_s11, %s1553_s16  ;;  %vm1280_vm3 = vcmask 122880  }
  0x30   : > { %v1821_v1 = vld [vmem:[%s1818_s21 + $0x8] sm:$0xff]  ;;  %v1824_v2 = vld [vmem:[%s1818_s21] sm:$0xff]  ;;  %v1839_v7 = vld [vmem:[%s1818_s21 + $0x10] sm:$0xff]  ;;  %1504 = vmatprep.subr.bf16.mxu0 %v1698_v19 }
  0x31   : > { %430 = vperm.xlu1 %1589, %v1821_v1   ;;  %425 = vperm.xlu0 %1588, %v1824_v2   ;;  %v1829_v3 = vld [vmem:[%s1818_s21 + $0x20] sm:$0xff]  ;;  %v1844_v8 = vld [vmem:[%s1818_s21 + $0x18] sm:$0xff]  ;;  %v1867_v11 = vld [vmem:[%s1818_s21 + $0x28] sm:$0xff] }
  0x32   : > { %v1883_v15 = vld [vmem:[%s1818_s21 + $0x30] sm:$0x1]  ;;  %v475_v55 = vld [vmem:[#allocation2 + $0x48] sm:$0xff]  ;;  %v416_v22 = vld [vmem:[#allocation2] sm:$0xff] }
  0x33   : > { %1506 = vmatpush3.bf16.msra.mxu0 %v1505_v23  ;;  %v418_v48 = vld [vmem:[#allocation2 + $0x10] sm:$0xff]  ;;  %v402_v27 = vld [vmem:[%s2247_s2] sm:$0xff] }
  0x34   : > { %1507 = vmatprep.subr.bf16.mxu0 %v1698_v19  ;;  %v404_v52 = vld [vmem:[%s2247_s2 + $0x10] sm:$0xff] }
  0x35   : > { %1590 = vset.pattern.permute.xlu1 %v1689_v4  ;;  %445 = vperm.xlu0 %1588, %v1829_v3   ;;  %v574_v60 = vld [vmem:[#allocation2 + $0xb0] sm:$0xff] }
  0x36   : > { %531 = vperm.xlu1 %1590, %v1824_v2  }
  0x37   : > { %1509 = vmatpush3.bf16.msra.mxu0 %v1508_v26 }
  0x38   : > { %1510 = vmatprep.subr.bf16.mxu0 %v1698_v19 }
  0x39   : > { %1602 = vset.pattern.permute.xlu0 %v1690_v5 }
  0x3a   : > { %1591 = vset.pattern.permute.xlu1 %v1691_v6  ;;  %581 = vperm.xlu0 %1602, %v1824_v2  }
  0x3b   : > { %485 = vperm.xlu1 %1591, %v1821_v1   ;;  %1512 = vmatpush3.bf16.msra.mxu0 %v1511_v29  ;;  %v473_v29 = vld [vmem:[#allocation2 + $0x38] sm:$0xff] }
  0x3c   : > { %1513 = vmatprep.subr.bf16.mxu0 %v1698_v19 }
  0x3e   : > { %589 = vperm.xlu0 %1602, %v1839_v7  }
  0x3f   : > { %1592 = vset.pattern.permute.xlu1 %v1688_v0 }
  0x40   : > { %435 = vperm.xlu1 %1592, %v1839_v7  }
  0x42   : > { %593 = vperm.xlu0 %1602, %v1844_v8  }
  0x44   : > { %1593 = vset.pattern.permute.xlu1 %v1689_v4 }
  0x45   : > { %535 = vperm.xlu1 %1593, %v1821_v1  }
  0x46   : > { %1609 = vset.pattern.permute.xlu0 %v1692_v9 }
  0x47   : > { %881 = vperm.xlu0 %1609, %v1824_v2  }
  0x49   : > { %1594 = vset.pattern.permute.xlu1 %v1691_v6 }
  0x4a   : > { %489 = vperm.xlu1 %1594, %v1839_v7  }
  0x4b   : > { %1610 = vset.pattern.permute.xlu0 %v1693_v10 }
  0x4c   : > { %631 = vperm.xlu0 %1610, %v1824_v2  }
  0x4e   : > { %1595 = vset.pattern.permute.xlu1 %v1690_v5 }
  0x4f   : > { %585 = vperm.xlu1 %1595, %v1821_v1  }
  0x50   : > { %635 = vperm.xlu0 %1610, %v1821_v1  }
  0x53   : > { %1596 = vset.pattern.permute.xlu1 %v1688_v0 }
  0x54   : > { %440 = vperm.xlu1 %1596, %v1844_v8   ;;  %643 = vperm.xlu0 %1610, %v1844_v8  }
  0x58   : > { %1597 = vset.pattern.permute.xlu1 %v1689_v4  ;;  %1613 = vset.pattern.permute.xlu0 %v1691_v6 }
  0x59   : > { %539 = vperm.xlu1 %1597, %v1839_v7   ;;  %481 = vperm.xlu0 %1613, %v1824_v2  }
  0x5d   : > { %1598 = vset.pattern.permute.xlu1 %v1694_v12  ;;  %501 = vperm.xlu0 %1613, %v1867_v11  }
  0x5e   : > { %731 = vperm.xlu1 %1598, %v1824_v2  }
  0x61   : > { %1616 = vset.pattern.permute.xlu0 %v1695_v13 }
  0x62   : > { %1599 = vset.pattern.permute.xlu1 %v1691_v6  ;;  %681 = vperm.xlu0 %1616, %v1824_v2  }
  0x63   : > { %493 = vperm.xlu1 %1599, %v1844_v8  }
  0x66   : > { %697 = vperm.xlu0 %1616, %v1829_v3  }
  0x67   : > { %1600 = vset.pattern.permute.xlu1 %v1695_v13 }
  0x68   : > { %685 = vperm.xlu1 %1600, %v1821_v1  }
  0x6a   : > { %1625 = vset.pattern.permute.xlu0 %v1689_v4 }
  0x6b   : > { %551 = vperm.xlu0 %1625, %v1867_v11  }
  0x6c   : > { %1601 = vset.pattern.permute.xlu1 %v1696_v14 }
  0x6d   : > { %781 = vperm.xlu1 %1601, %v1824_v2  }
  0x6f   : > { %555 = vperm.xlu0 %1625, %v1883_v15  }
  0x71   : > { %1603 = vset.pattern.permute.xlu1 %v1689_v4 }
  0x72   : > { %543 = vperm.xlu1 %1603, %v1844_v8  }
  0x73   : > { %1628 = vset.pattern.permute.xlu0 %v1697_v16 }
  0x74   : > { %839 = vperm.xlu0 %1628, %v1839_v7  }
  0x76   : > { %1604 = vset.pattern.permute.xlu1 %v1693_v10 }
  0x77   : > { %639 = vperm.xlu1 %1604, %v1839_v7  }
  0x78   : > { %843 = vperm.xlu0 %1628, %v1844_v8  }
  0x7b   : > { %1605 = vset.pattern.permute.xlu1 %v1697_v16 }
  0x7c   : > { %831 = vperm.xlu1 %1605, %v1824_v2   ;;  %1631 = vset.pattern.permute.xlu0 %v1694_v12 }
  0x7d   : > { %735 = vperm.xlu0 %1631, %v1821_v1  }
  0x80   : > { %1606 = vset.pattern.permute.xlu1 %v1691_v6 }
  0x81   : > { %497 = vperm.xlu1 %1606, %v1829_v3   ;;  %751 = vperm.xlu0 %1631, %v1867_v11  }
  0x85   : > { %1607 = vset.pattern.permute.xlu1 %v1695_v13  ;;  %1636 = vset.pattern.permute.xlu0 %v1696_v14 }
  0x86   : > { %689 = vperm.xlu1 %1607, %v1839_v7   ;;  %789 = vperm.xlu0 %1636, %v1839_v7  }
  0x8a   : > { %1608 = vset.pattern.permute.xlu1 %v1696_v14  ;;  %797 = vperm.xlu0 %1636, %v1829_v3  }
  0x8b   : > { %785 = vperm.xlu1 %1608, %v1821_v1  }
  0x8e   : > { %801 = vperm.xlu0 %1636, %v1867_v11  }
  0x8f   : > { %1611 = vset.pattern.permute.xlu1 %v1688_v0 }
  0x90   : > { %450 = vperm.xlu1 %1611, %v1867_v11  }
  0x92   : > { %1641 = vset.pattern.permute.xlu0 %v1697_v16 }
  0x93   : > { %851 = vperm.xlu0 %1641, %v1867_v11  }
  0x94   : > { %1612 = vset.pattern.permute.xlu1 %v1689_v4  ;;  %v575_v4 = vld [vmem:[#allocation2 + $0xb8] sm:$0xff] }
  0x95   : > { %547 = vperm.xlu1 %1612, %v1829_v3  }
  0x97   : > { %855 = vperm.xlu0 %1641, %v1883_v15  }
  0x99   : > { %1614 = vset.pattern.permute.xlu1 %v1694_v12 }
  0x9a   : > { %739 = vperm.xlu1 %1614, %v1839_v7  }
  0x9b   : > { %1644 = vset.pattern.permute.xlu0 %v1692_v9 }
  0x9e   : > { %1615 = vset.pattern.permute.xlu1 %v1697_v16 }
  0x9f   : > { %835 = vperm.xlu1 %1615, %v1821_v1  }
  0xa3   : > { %1617 = vset.pattern.permute.xlu1 %v1690_v5 }
  0xa4   : > { %597 = vperm.xlu1 %1617, %v1829_v3  }
  0xa8   : > { %1618 = vset.pattern.permute.xlu1 %v1695_v13 }
  0xa9   : > { %693 = vperm.xlu1 %1618, %v1844_v8  }
  0xad   : > { %1619 = vset.pattern.permute.xlu1 %v1692_v9 }
  0xae   : > { %885 = vperm.xlu1 %1619, %v1821_v1  }
  0xb0   : > { %v431_v31 = vpop.permute.xlu1 %430  ;;  %v1961_v32 = vpop.permute.xlu0 %425 }
  0xb1   : > { %v459_v36 = vmul.f32 %v431_v31, %v417_v33  ;;  %v458_v26 = vmul.f32 %v1961_v32, %v416_v22  ;;  %v405_v33 = vld [vmem:[%s2247_s2 + $0x18] sm:$0xff] }
  0xb2   : > { %1620 = vset.pattern.permute.xlu1 %v1688_v0 }
  0xb3   : > { %455 = vperm.xlu1 %1620, %v1883_v15   ;;  %v466_v41 = vadd.f32 %v459_v36, %v403_v37  ;;  %v476_v36 = vld [vmem:[#allocation2 + $0x50] sm:$0xff]  ;;  %v465_v37 = vadd.f32 %v458_v26, %v402_v27  ;;  %v873_v27 = vld [vmem:[#allocation2 + $0x1f8] sm:$0xff] }
  0xb4   : > { %v1965_v34 = vpop.permute.xlu0 %445 }
  0xb5   : > { %v1967_v35 = vpop.permute.xlu1 %531 }
  0xb7   : > { %1621 = vset.pattern.permute.xlu1 %v1693_v10 }
  0xb8   : > { %647 = vperm.xlu1 %1621, %v1829_v3  }
  0xb9   : > { %v1974_v39 = vpop.permute.xlu0 %581 }
  0xba   : > { %v486_v40 = vpop.permute.xlu1 %485 }
  0xbb   : > { %v509_v42 = vmul.f32 %v486_v40, %v474_v38 }
  0xbc   : > { %1622 = vset.pattern.permute.xlu1 %v1694_v12 }
  0xbd   : > { %v516_v43 = vadd.f32 %v509_v42, %v466_v41  ;;  %743 = vperm.xlu1 %1622, %v1844_v8   ;;  %v590_v44 = vpop.permute.xlu0 %589  ;;  %v523_v42 = vld [vmem:[#allocation2 + $0x70] sm:$0xff] }
  0xbe   : > { %v610_v18 = vmul.f32 %v590_v44, %v575_v4  ;;  %v723_v4 = vld [vmem:[#allocation2 + $0x150] sm:$0xff] }
  0xbf   : > { %v436_v45 = vpop.permute.xlu1 %435 }
  0xc0   : > { %v460_v51 = vmul.f32 %v436_v45, %v418_v48 }
  0xc1   : > { %1623 = vset.pattern.permute.xlu1 %v1691_v6  ;;  %v1979_v46 = vpop.permute.xlu0 %593  ;;  %v525_v6 = vld [vmem:[#allocation2 + $0x80] sm:$0xff] }
  0xc2   : > { %505 = vperm.xlu1 %1623, %v1883_v15   ;;  %v467_v57 = vadd.f32 %v460_v51, %v404_v52  ;;  %v623_v51 = vld [vmem:[#allocation2 + $0xe0] sm:$0xff] }
  0xc4   : > { %v536_v49 = vpop.permute.xlu1 %535 }
  0xc5   : > { %v559_v50 = vmul.f32 %v536_v49, %v524_v47  ;;  %v558_v47 = vmul.f32 %v1967_v35, %v523_v42  ;;  %v526_v35 = vld [vmem:[#allocation2 + $0x88] sm:$0xff] }
  0xc6   : > { %1624 = vset.pattern.permute.xlu1 %v1690_v5  ;;  %v1987_v54 = vpop.permute.xlu0 %881 }
  0xc7   : > { %v566_v53 = vadd.f32 %v559_v50, %v516_v43  ;;  %601 = vperm.xlu1 %1624, %v1867_v11  }
  0xc9   : > { %v490_v56 = vpop.permute.xlu1 %489 }
  0xca   : > { %v510_v58 = vmul.f32 %v490_v56, %v475_v55  ;;  %v576_v56 = vld [vmem:[#allocation2 + $0xc0] sm:$0xff] }
  0xcb   : > { %1626 = vset.pattern.permute.xlu1 %v1696_v14  ;;  %v632_v61 = vpop.permute.xlu0 %631 }
  0xcc   : > { %v517_v59 = vadd.f32 %v510_v58, %v467_v57  ;;  %793 = vperm.xlu1 %1626, %v1844_v8   ;;  %v673_v57 = vld [vmem:[#allocation2 + $0x118] sm:$0xff] }
  0xce   : > { %v586_v62 = vpop.permute.xlu1 %585 }
  0xcf   : > { %v609_v63 = vmul.f32 %v586_v62, %v574_v60  ;;  %v1995_v1 = vpop.permute.xlu0 %635  ;;  %v611_v62 = vmul.f32 %v1979_v46, %v576_v56 }
  0xd0   : > { %1627 = vset.pattern.permute.xlu1 %v1692_v9 }
  0xd1   : > { %v1992_v0 = vadd.f32 %v609_v63, %v566_v53  ;;  %889 = vperm.xlu1 %1627, %v1839_v7   ;;  %v419_v7 = vld [vmem:[#allocation2 + $0x18] sm:$0xff]  ;;  %v658_v53 = vmul.f32 %v632_v61, %v623_v51  ;;  %v421_v51 = vld [vmem:[#allocation2 + $0x28] sm:$0xff] }
  0xd3   : > { %v441_v2 = vpop.permute.xlu1 %440  ;;  %v644_v20 = vpop.permute.xlu0 %643 }
  0xd4   : > { %v461_v28 = vmul.f32 %v441_v2, %v419_v7 }
  0xd5   : > { %1629 = vset.pattern.permute.xlu1 %v1693_v10 }
  0xd6   : > { %651 = vperm.xlu1 %1629, %v1867_v11   ;;  %v468_v32 = vadd.f32 %v461_v28, %v405_v33  ;;  %v406_v33 = vld [vmem:[%s2247_s2 + $0x20] sm:$0xff] }
  0xd8   : > { %v540_v17 = vpop.permute.xlu1 %539  ;;  %v482_v31 = vpop.permute.xlu0 %481 }
  0xd9   : > { %v560_v21 = vmul.f32 %v540_v17, %v525_v6  ;;  %v508_v38 = vmul.f32 %v482_v31, %v473_v29  ;;  %v773_v6 = vld [vmem:[#allocation2 + $0x188] sm:$0xff] }
  0xda   : > { %1630 = vset.pattern.permute.xlu1 %v1694_v12 }
  0xdb   : > { %v567_v23 = vadd.f32 %v560_v21, %v517_v59  ;;  %747 = vperm.xlu1 %1630, %v1829_v3   ;;  %v515_v44 = vadd.f32 %v508_v38, %v465_v37  ;;  %v626_v59 = vld [vmem:[#allocation2 + $0xf8] sm:$0xff] }
  0xdc   : > { %v2015_v48 = vpop.permute.xlu0 %501 }
  0xdd   : > { %v732_v24 = vpop.permute.xlu1 %731  ;;  %v617_v25 = vadd.f32 %v610_v18, %v567_v23  ;;  %v565_v50 = vadd.f32 %v558_v47, %v515_v44  ;;  %v420_v23 = vld [vmem:[#allocation2 + $0x20] sm:$0xff] }
  0xde   : > { %v758_v7 = vmul.f32 %v732_v24, %v723_v4  ;;  %v462_v29 = vmul.f32 %v1965_v34, %v420_v23  ;;  %v908_v24 = vmul.f32 %v1987_v54, %v873_v27  ;;  %v2041_v34 = vld [vmem:[%s2248_s3] ss:$0 sm:$0xff] }
  0xdf   : > { %1632 = vset.pattern.permute.xlu1 %v1690_v5  ;;  %v573_v5 = vld [vmem:[#allocation2 + $0xa8] sm:$0xff]  ;;  %v2046_v54 = vld [vmem:[%s2249_s4] ss:$0 sm:$0xff] }
  0xe0   : > { %605 = vperm.xlu1 %1632, %v1883_v15   ;;  %v608_v49 = vmul.f32 %v1974_v39, %v573_v5  ;;  %v469_v38 = vadd.f32 %v462_v29, %v406_v33  ;;  %v1129_v33 = vld [vmem:[%s2253_s8 + $0x38] sm:$0xff] }
  0xe1   : > { %v682_v58 = vpop.permute.xlu0 %681 }
  0xe2   : > { %v494_v40 = vpop.permute.xlu1 %493  ;;  %v615_v55 = vadd.f32 %v608_v49, %v565_v50  ;;  %v708_v63 = vmul.f32 %v682_v58, %v673_v57  ;;  %v478_v50 = vld [vmem:[#allocation2 + $0x60] sm:$0xff] }
  0xe3   : > { %v511_v41 = vmul.f32 %v494_v40, %v476_v36 }
  0xe4   : > { %1633 = vset.pattern.permute.xlu1 %v1695_v13  ;;  %v665_v39 = vadd.f32 %v658_v53, %v615_v55  ;;  %v513_v55 = vmul.f32 %v2015_v48, %v478_v50  ;;  %v1122_v48 = vld [vmem:[%s2253_s8] sm:$0xff]  ;;  %v1132_v50 = vld [vmem:[%s2253_s8 + $0x50] sm:$0xff] }
  0xe5   : > { %v518_v43 = vadd.f32 %v511_v41, %v468_v32  ;;  %701 = vperm.xlu1 %1633, %v1867_v11   ;;  %v2052_v44 = vpop.permute.xlu0 %697 }
  0xe6   : > { %v715_v17 = vadd.f32 %v708_v63, %v665_v39 }
  0xe7   : > { %v2012_v45 = vpop.permute.xlu1 %685 }
  0xe8   : > { %v765_v28 = vadd.f32 %v758_v7, %v715_v17  ;;  %v674_v7 = vld [vmem:[#allocation2 + $0x120] sm:$0xff] }
  0xe9   : > { %1634 = vset.pattern.permute.xlu1 %v1692_v9 }
  0xea   : > { %893 = vperm.xlu1 %1634, %v1844_v8   ;;  %v661_v8 = vmul.f32 %v644_v20, %v626_v59  ;;  %v823_v20 = vld [vmem:[#allocation2 + $0x1c0] sm:$0xff]  ;;  %v552_v49 = vpop.permute.xlu0 %551 }
  0xec   : > { %v782_v52 = vpop.permute.xlu1 %781 }
  0xed   : > { %v808_v26 = vmul.f32 %v782_v52, %v773_v6  ;;  %v528_v52 = vld [vmem:[#allocation2 + $0x98] sm:$0xff]  ;;  %v624_v6 = vld [vmem:[#allocation2 + $0xe8] sm:$0xff] }
  0xee   : > { %1635 = vset.pattern.permute.xlu1 %v1693_v10  ;;  %v625_v10 = vld [vmem:[#allocation2 + $0xf0] sm:$0xff]  ;;  %v2069_v57 = vpop.permute.xlu0 %555  ;;  %v563_v58 = vmul.f32 %v552_v49, %v528_v52  ;;  %v659_v23 = vmul.f32 %v1995_v1, %v624_v6  ;;  %v709_v1 = vmul.f32 %v2012_v45, %v674_v7  ;;  %v1131_v45 = vld [vmem:[%s2253_s8 + $0x48] sm:$0xff]  ;;  %v874_v49 = vld [vmem:[#allocation2 + $0x200] sm:$0xff] }
  0xef   : > { %655 = vperm.xlu1 %1635, %v1883_v15   ;;  %v815_v36 = vadd.f32 %v808_v26, %v765_v28  ;;  %v577_v26 = vld [vmem:[#allocation2 + $0xc8] sm:$0xff] }
  0xf1   : > { %v544_v60 = vpop.permute.xlu1 %543 }
  0xf2   : > { %v561_v2 = vmul.f32 %v544_v60, %v526_v35 }
  0xf3   : > { %1637 = vset.pattern.permute.xlu1 %v1697_v16  ;;  %v2074_v39 = vpop.permute.xlu0 %839 }
  0xf4   : > { %v568_v61 = vadd.f32 %v561_v2, %v518_v43  ;;  %847 = vperm.xlu1 %1637, %v1829_v3  }
  0xf6   : > { %v618_v18 = vadd.f32 %v611_v62, %v568_v61  ;;  %v640_v21 = vpop.permute.xlu1 %639 }
  0xf7   : > { %v660_v22 = vmul.f32 %v640_v21, %v625_v10  ;;  %v1125_v10 = vld [vmem:[%s2253_s8 + $0x18] sm:$0xff]  ;;  %v2090_v4 = vpop.permute.xlu0 %843  ;;  %v1126_v21 = vld [vmem:[%s2253_s8 + $0x20] sm:$0xff] }
  0xf8   : > { %1638 = vset.pattern.permute.xlu1 %v1695_v13  ;;  %v2026_v46 = vadd.f32 %v661_v8, %v618_v18  ;;  %v1124_v8 = vld [vmem:[%s2253_s8 + $0x10] sm:$0xff] }
  0xf9   : > { %v2028_v16 = vadd.f32 %v660_v22, %v617_v25  ;;  %705 = vperm.xlu1 %1638, %v1883_v15   ;;  %v477_v25 = vld [vmem:[#allocation2 + $0x58] sm:$0xff]  ;;  %v1517_v18 = vpack.c.bf16 %v1125_v10, %v1124_v8  ;;  %v1127_v22 = vld [vmem:[%s2253_s8 + $0x28] sm:$0xff] }
  0xfa   : > { %v1520_v27 = vpack.c.bf16 %v1127_v22, %v1126_v21  ;;  %v408_v21 = vld [vmem:[%s2247_s2 + $0x30] sm:$0x1]  ;;  %v479_v22 = vld [vmem:[#allocation2 + $0x68] sm:$0x1] }
  0xfb   : > { %v832_v31 = vpop.permute.xlu1 %831 }
  0xfc   : > { %v858_v13 = vmul.f32 %v832_v31, %v823_v20  ;;  %v724_v20 = vld [vmem:[#allocation2 + $0x158] sm:$0xff]  ;;  %v736_v28 = vpop.permute.xlu0 %735  ;;  %v1128_v31 = vld [vmem:[%s2253_s8 + $0x30] sm:$0xff] }
  0xfd   : > { %1639 = vset.pattern.permute.xlu1 %v1692_v9 }
  0xfe   : > { %v865_v37 = vadd.f32 %v858_v13, %v815_v36  ;;  %897 = vperm.xlu1 %1639, %v1829_v3   ;;  %v666_v36 = vadd.f32 %v659_v23, %v1992_v0  ;;  %v774_v13 = vld [vmem:[#allocation2 + $0x190] sm:$0xff]  ;;  %v675_v23 = vld [vmem:[#allocation2 + $0x128] sm:$0xff] }
 0x100   : > { %v915_v40 = vadd.f32 %v908_v24, %v865_v37  ;;  %v498_v32 = vpop.permute.xlu1 %497  ;;  %v759_v37 = vmul.f32 %v736_v28, %v724_v20  ;;  %v716_v0 = vadd.f32 %v709_v1, %v666_v36  ;;  %v775_v36 = vld [vmem:[#allocation2 + $0x198] sm:$0xff] }
 0x101   : > { %v512_v41 = vmul.f32 %v498_v32, %v477_v25  ;;  %v1130_v32 = vld [vmem:[%s2253_s8 + $0x40] sm:$0xff] }
 0x102   : > { %v929_v42 = vmul.f32 %v2041_v34, %v915_v40  ;;  %1640 = vset.pattern.permute.xlu1 %v1694_v12  ;;  %v824_v40 = vld [vmem:[#allocation2 + $0x1c8] sm:$0xff] }
 0x103   : > { %v519_v3 = vadd.f32 %v512_v41, %v469_v38  ;;  %755 = vperm.xlu1 %1640, %v1883_v15   ;;  %v1523_v38 = vpack.c.bf16 %v1129_v33, %v1128_v31  ;;  %v676_v31 = vld [vmem:[#allocation2 + $0x130] sm:$0xff] }
 0x104   : > { %v943_v43 = vadd.f32 %v2046_v54, %v929_v42 }
 0x105   : > { %v2054_v5 = vpop.permute.xlu1 %689 }
 0x106   : > { %v950_v47 = vmax.f32 %v943_v43, 0.0 }
 0x107   : > { %1642 = vset.pattern.permute.xlu1 %v1696_v14  ;;  %v407_v14 = vld [vmem:[%s2247_s2 + $0x28] sm:$0xff] }
 0x108   : > { %805 = vperm.xlu1 %1642, %v1883_v15   ;;  %1428 = vmatmul.mubr.msk.f32.vlgmr.msra.gmra.mrb[0].mxu0 %vm965_vm1, %v950_v47  ;;  %v1526_v47 = vpack.c.bf16 %v1131_v45, %v1130_v32  ;;  %v826_v32 = vld [vmem:[#allocation2 + $0x1d8] sm:$0xff] }
 0x109   : > { %1430 = vmatprep.mubr.msk.f32.mxu0 %vm1699_vm0, %v1700_v30 }
 0x10a   : > { %v2061_v12 = vpop.permute.xlu1 %785 }
 0x10b   : > { %v809_v41 = vmul.f32 %v2061_v12, %v774_v13 }
 0x10c   : > { %1643 = vset.pattern.permute.xlu1 %v1692_v9  ;;  %v527_v9 = vld [vmem:[#allocation2 + $0x90] sm:$0xff] }
 0x10d   : > { %901 = vperm.xlu1 %1643, %v1867_v11  }
 0x10f   : > { %v451_v53 = vpop.permute.xlu1 %450 }
 0x110   : > { %v463_v56 = vmul.f32 %v451_v53, %v421_v51  ;;  %v1133_v51 = vld [vmem:[%s2253_s8 + $0x58] sm:$0xff] }
 0x111   : > { %905 = vperm.xlu1 %1643, %v1883_v15   ;;  %v1123_v15 = vld [vmem:[%s2253_s8 + $0x8] sm:$0xff] }
 0x112   : > { %v470_v35 = vadd.f32 %v463_v56, %v407_v14  ;;  %v1514_v61 = vpack.c.bf16 %v1123_v15, %v1122_v48 }
 0x114   : > { %v520_v59 = vadd.f32 %v513_v55, %v470_v35  ;;  %v548_v60 = vpop.permute.xlu1 %547  ;;  %1515 = vmatpush3.bf16.msra.mxu0 %v1514_v61  ;;  %1545 = vmatpush3.bf16.msra.mxu1 %v1514_v61  ;;  %v1529_v55 = vpack.c.bf16 %v1133_v51, %v1132_v50  ;;  %v422_v61 = vld [vmem:[#allocation2 + $0x30] sm:$0x1] }
 0x115   : > { %v562_v11 = vmul.f32 %v548_v60, %v527_v9  ;;  %1516 = vmatprep.subr.bf16.mxu0 %v1698_v19  ;;  %1538 = vmatprep.subr.bf16.mxu1 %v1698_v19  ;;  %v627_v60 = vld [vmem:[#allocation2 + $0x100] sm:$0xff] }
 0x116   : > { %v2072_v62 = vadd.f32 %v563_v58, %v520_v59  ;;  %v677_v59 = vld [vmem:[#allocation2 + $0x138] sm:$0xff] }
 0x117   : > { %v569_v63 = vadd.f32 %v562_v11, %v519_v3  ;;  %v766_v3 = vadd.f32 %v759_v37, %v716_v0  ;;  %v712_v48 = vmul.f32 %v2052_v44, %v677_v59  ;;  %v2143_v44 = vpop.permute.xlu0 %751 }
 0x118   : > { %1518 = vmatpush3.bf16.msra.mxu0 %v1517_v18  ;;  %1546 = vmatpush3.bf16.msra.mxu1 %v1517_v18  ;;  %v529_v18 = vld [vmem:[#allocation2 + $0xa0] sm:$0x1] }
 0x119   : > { %v2076_v2 = vpop.permute.xlu1 %739  ;;  %1519 = vmatprep.subr.bf16.mxu0 %v1698_v19  ;;  %1539 = vmatprep.subr.bf16.mxu1 %v1698_v19  ;;  %v816_v12 = vadd.f32 %v809_v41, %v766_v3  ;;  %v776_v41 = vld [vmem:[#allocation2 + $0x1a0] sm:$0xff] }
 0x11b   : > { %v790_v13 = vpop.permute.xlu0 %789 }
 0x11c   : > { %1521 = vmatpush3.bf16.msra.mxu0 %v1520_v27  ;;  %1547 = vmatpush3.bf16.msra.mxu1 %v1520_v27  ;;  %v725_v27 = vld [vmem:[#allocation2 + $0x160] sm:$0xff]  ;;  %v810_v0 = vmul.f32 %v790_v13, %v775_v36 }
 0x11d   : > { %1522 = vmatprep.subr.bf16.mxu0 %v1698_v19  ;;  %1540 = vmatprep.subr.bf16.mxu1 %v1698_v19  ;;  %v760_v1 = vmul.f32 %v2076_v2, %v725_v27  ;;  %v861_v2 = vmul.f32 %v2090_v4, %v826_v32  ;;  %v1134_v4 = vld [vmem:[%s2253_s8 + $0x60] sm:$0xff] }
 0x11e   : > { %v836_v17 = vpop.permute.xlu1 %835  ;;  %v678_v13 = vld [vmem:[#allocation2 + $0x140] sm:$0xff] }
 0x11f   : > { %v859_v43 = vmul.f32 %v836_v17, %v824_v40 }
 0x120   : > { %1524 = vmatpush3.bf16.msra.mxu0 %v1523_v38  ;;  %1548 = vmatpush3.bf16.msra.mxu1 %v1523_v38 }
 0x121   : > { %1525 = vmatprep.subr.bf16.mxu0 %v1698_v19  ;;  %1541 = vmatprep.subr.bf16.mxu1 %v1698_v19  ;;  %v866_v53 = vadd.f32 %v859_v43, %v816_v12  ;;  %v875_v12 = vld [vmem:[#allocation2 + $0x208] sm:$0xff] }
 0x123   : > { %v598_v29 = vpop.permute.xlu1 %597 }
 0x124   : > { %v612_v24 = vmul.f32 %v598_v29, %v577_v26  ;;  %1527 = vmatpush3.bf16.msra.mxu0 %v1526_v47  ;;  %1549 = vmatpush3.bf16.msra.mxu1 %v1526_v47  ;;  %v564_v26 = vmul.f32 %v2069_v57, %v529_v18  ;;  %v710_v29 = vmul.f32 %v2054_v5, %v675_v23  ;;  %v825_v5 = vld [vmem:[#allocation2 + $0x1d0] sm:$0xff] }
 0x125   : > { %1528 = vmatprep.subr.bf16.mxu0 %v1698_v19  ;;  %1542 = vmatprep.subr.bf16.mxu1 %v1698_v19  ;;  %v727_v23 = vld [vmem:[#allocation2 + $0x170] sm:$0xff] }
 0x126   : > { %v619_v25 = vadd.f32 %v612_v24, %v569_v63  ;;  %v726_v24 = vld [vmem:[#allocation2 + $0x168] sm:$0xff]  ;;  %v717_v40 = vadd.f32 %v710_v29, %v2028_v16  ;;  %v827_v29 = vld [vmem:[#allocation2 + $0x1e0] sm:$0xff] }
 0x128   : > { %v694_v42 = vpop.permute.xlu1 %693  ;;  %1530 = vmatpush3.bf16.msra.mxu0 %v1529_v55  ;;  %1550 = vmatpush3.bf16.msra.mxu1 %v1529_v55  ;;  %v767_v45 = vadd.f32 %v760_v1, %v717_v40 }
 0x129   : > { %1531 = vmatprep.subr.bf16.mxu0 %v1698_v19  ;;  %1543 = vmatprep.subr.bf16.mxu1 %v1698_v19  ;;  %v711_v37 = vmul.f32 %v694_v42, %v676_v31  ;;  %v860_v42 = vmul.f32 %v2074_v39, %v825_v5  ;;  %v1135_v39 = vld [vmem:[%s2253_s8 + $0x68] sm:$0xff]  ;;  %v728_v5 = vld [vmem:[#allocation2 + $0x178] sm:$0xff] }
 0x12a   : > { %v817_v50 = vadd.f32 %v810_v0, %v767_v45  ;;  %v628_v31 = vld [vmem:[#allocation2 + $0x108] sm:$0xff] }
 0x12b   : > { %v718_v3 = vadd.f32 %v711_v37, %v2026_v46 }
 0x12d   : > { %v886_v52 = vpop.permute.xlu1 %885 }
 0x12e   : > { %v909_v14 = vmul.f32 %v886_v52, %v874_v49 }
 0x130   : > { %v916_v56 = vadd.f32 %v909_v14, %v866_v53  ;;  %v867_v53 = vadd.f32 %v860_v42, %v817_v50  ;;  %v763_v50 = vmul.f32 %v2143_v44, %v728_v5  ;;  %v779_v44 = vld [vmem:[#allocation2 + $0x1b8] sm:$0x1] }
 0x132   : > { %v930_v58 = vmul.f32 %v2041_v34, %v916_v56  ;;  %v456_v35 = vpop.permute.xlu1 %455 }
 0x133   : > { %v464_v17 = vmul.f32 %v456_v35, %v422_v61 }
 0x134   : > { %v944_v9 = vadd.f32 %v2046_v54, %v930_v58 }
 0x135   : > { %v471_v20 = vadd.f32 %v464_v17, %v408_v21 }
 0x136   : > { %v951_v11 = vmax.f32 %v944_v9, 0.0  ;;  %v1532_v9 = vpack.c.bf16 %v1135_v39, %v1134_v4  ;;  %v828_v39 = vld [vmem:[#allocation2 + $0x1e8] sm:$0xff] }
 0x137   : > { %v648_v63 = vpop.permute.xlu1 %647 }
 0x138   : > { %v662_v15 = vmul.f32 %v648_v63, %v627_v60  ;;  %1431 = vmatmul.mubr.msk.f32.gmra.mrb[2].mxu0 %vm965_vm1, %v951_v11  ;;  %1551 = vmatpush3.bf16.msra.mxu1 %v1532_v9  ;;  %v1136_v60 = vld [vmem:[%s2253_s8 + $0x70] sm:$0xff]  ;;  %v1137_v11 = vld [vmem:[%s2253_s8 + $0x78] sm:$0xff] }
 0x139   : > { %1433 = vmatprep.mubr.msk.f32.mxu0 %vm1699_vm0, %v1700_v30  ;;  %1533 = vmatpush3.bf16.msra.mxu0 %v1532_v9  ;;  %v1535_v63 = vpack.c.bf16 %v1137_v11, %v1136_v60 }
 0x13a   : > { %v669_v8 = vadd.f32 %v662_v15, %v619_v25  ;;  %1534 = vmatprep.subr.bf16.mxu0 %v1698_v19  ;;  %1544 = vmatprep.subr.bf16.mxu1 %v1698_v19  ;;  %v777_v19 = vld [vmem:[#allocation2 + $0x1a8] sm:$0xff] }
 0x13c   : > { %v744_v10 = vpop.permute.xlu1 %743  ;;  %v2138_v6 = vadd.f32 %v712_v48, %v669_v8  ;;  %1552 = vmatpush3.bf16.msra.mxu1 %v1535_v63  ;;  %v876_v8 = vld [vmem:[#allocation2 + $0x210] sm:$0xff] }
 0x13d   : > { %v761_v57 = vmul.f32 %v744_v10, %v726_v24  ;;  %1536 = vmatpush3.bf16.msra.mxu0 %v1535_v63 }
 0x13f   : > { %v768_v47 = vadd.f32 %v761_v57, %v718_v3  ;;  %v877_v57 = vld [vmem:[#allocation2 + $0x218] sm:$0xff] }
 0x140   : > { %v579_v3 = vld [vmem:[#allocation2 + $0xd8] sm:$0x1] }
 0x141   : > { %v506_v7 = vpop.permute.xlu1 %505 }
 0x142   : > { %v514_v28 = vmul.f32 %v506_v7, %v479_v22 }
 0x144   : > { %v521_v33 = vadd.f32 %v514_v28, %v471_v20  ;;  %v798_v20 = vpop.permute.xlu0 %797  ;;  %v578_v28 = vld [vmem:[#allocation2 + $0xd0] sm:$0xff] }
 0x145   : > { %v812_v1 = vmul.f32 %v798_v20, %v777_v19 }
 0x146   : > { %v2148_v25 = vpop.permute.xlu1 %601  ;;  %v2150_v38 = vadd.f32 %v564_v26, %v521_v33 }
 0x147   : > { %v613_v36 = vmul.f32 %v2148_v25, %v578_v28 }
 0x149   : > { %v620_v45 = vadd.f32 %v613_v36, %v2072_v62 }
 0x14b   : > { %v794_v43 = vpop.permute.xlu1 %793 }
 0x14c   : > { %v811_v49 = vmul.f32 %v794_v43, %v776_v41 }
 0x14e   : > { %v818_v51 = vadd.f32 %v811_v49, %v768_v47  ;;  %v802_v49 = vpop.permute.xlu0 %801 }
 0x150   : > { %v890_v52 = vpop.permute.xlu1 %889  ;;  %v868_v16 = vadd.f32 %v861_v2, %v818_v51 }
 0x151   : > { %v910_v14 = vmul.f32 %v890_v52, %v875_v12  ;;  %v778_v12 = vld [vmem:[#allocation2 + $0x1b0] sm:$0xff]  ;;  %v679_v52 = vld [vmem:[#allocation2 + $0x148] sm:$0x1] }
 0x153   : > { %v917_v55 = vadd.f32 %v910_v14, %v867_v53 }
 0x155   : > { %v931_v56 = vmul.f32 %v2041_v34, %v917_v55  ;;  %v652_v58 = vpop.permute.xlu1 %651  ;;  %v729_v55 = vld [vmem:[#allocation2 + $0x180] sm:$0x1] }
 0x156   : > { %v663_v40 = vmul.f32 %v652_v58, %v628_v31 }
 0x157   : > { %v945_v46 = vadd.f32 %v2046_v54, %v931_v56 }
 0x158   : > { %v670_v47 = vadd.f32 %v663_v40, %v620_v45 }
 0x159   : > { %v952_v35 = vmax.f32 %v945_v46, 0.0  ;;  %v813_v46 = vmul.f32 %v802_v49, %v778_v12 }
 0x15a   : > { %v748_v59 = vpop.permute.xlu1 %747 }
 0x15b   : > { %1434 = vmatmul.mubr.msk.f32.gmra.mrb[4].mxu0 %vm965_vm1, %v952_v35  ;;  %v762_v27 = vmul.f32 %v748_v59, %v727_v23  ;;  %v852_v35 = vpop.permute.xlu0 %851 }
 0x15c   : > { %1436 = vmatprep.mubr.msk.f32.mxu0 %vm1699_vm0, %v1700_v30 }
 0x15d   : > { %v769_v33 = vadd.f32 %v762_v27, %v2138_v6  ;;  %v629_v6 = vld [vmem:[#allocation2 + $0x110] sm:$0x1] }
 0x15f   : > { %v606_v48 = vpop.permute.xlu1 %605  ;;  %v819_v32 = vadd.f32 %v812_v1, %v769_v33 }
 0x160   : > { %v614_v25 = vmul.f32 %v606_v48, %v579_v3  ;;  %v863_v48 = vmul.f32 %v852_v35, %v828_v39 }
 0x162   : > { %v621_v56 = vadd.f32 %v614_v25, %v2150_v38  ;;  %v829_v38 = vld [vmem:[#allocation2 + $0x1f0] sm:$0x1] }
 0x164   : > { %v702_v15 = vpop.permute.xlu1 %701 }
 0x165   : > { %v713_v0 = vmul.f32 %v702_v15, %v678_v13 }
 0x167   : > { %v720_v51 = vadd.f32 %v713_v0, %v670_v47 }
 0x169   : > { %v894_v61 = vpop.permute.xlu1 %893  ;;  %v770_v58 = vadd.f32 %v763_v50, %v720_v51 }
 0x16a   : > { %v911_v10 = vmul.f32 %v894_v61, %v876_v8  ;;  %v856_v61 = vpop.permute.xlu0 %855 }
 0x16b   : > { %v820_v63 = vadd.f32 %v813_v46, %v770_v58  ;;  %v864_v23 = vmul.f32 %v856_v61, %v829_v38 }
 0x16c   : > { %v918_v17 = vadd.f32 %v911_v10, %v868_v16  ;;  %v878_v10 = vld [vmem:[#allocation2 + $0x220] sm:$0xff] }
 0x16e   : > { %v932_v18 = vmul.f32 %v2041_v34, %v918_v17  ;;  %v656_v21 = vpop.permute.xlu1 %655 }
 0x16f   : > { %v664_v62 = vmul.f32 %v656_v21, %v629_v6  ;;  %v870_v21 = vadd.f32 %v863_v48, %v820_v63  ;;  %v1370_v48 = vld [vmem:[%s2255_s10] ss:$0 sm:$0xff] }
 0x170   : > { %v946_v22 = vadd.f32 %v2046_v54, %v932_v18 }
 0x171   : > { %v671_v59 = vadd.f32 %v664_v62, %v621_v56 }
 0x172   : > { %v953_v7 = vmax.f32 %v946_v22, 0.0 }
 0x173   : > { %v848_v26 = vpop.permute.xlu1 %847 }
 0x174   : > { %1437 = vmatmul.mubr.msk.f32.gmra.mrb[6].mxu0 %vm965_vm1, %v953_v7  ;;  %v862_v37 = vmul.f32 %v848_v26, %v827_v29  ;;  %v879_v26 = vld [vmem:[#allocation2 + $0x228] sm:$0x1] }
 0x175   : > { %1439 = vmatprep.mubr.msk.f32.mxu0 %vm1699_vm0, %v1700_v30 }
 0x176   : > { %v869_v43 = vadd.f32 %v862_v37, %v819_v32  ;;  %v1367_v37 = vld [vmem:[%s2251_s6] ss:$0 sm:$0xff] }
 0x178   : > { %v706_v24 = vpop.permute.xlu1 %705 }
 0x179   : > { %v714_v4 = vmul.f32 %v706_v24, %v679_v52 }
 0x17b   : > { %v721_v15 = vadd.f32 %v714_v4, %v671_v59 }
 0x17d   : > { %v898_v41 = vpop.permute.xlu1 %897 }
 0x17e   : > { %v912_v2 = vmul.f32 %v898_v41, %v877_v57 }
 0x180   : > { %v919_v42 = vadd.f32 %v912_v2, %v869_v43 }
 0x182   : > { %v933_v16 = vmul.f32 %v2041_v34, %v919_v42  ;;  %v756_v53 = vpop.permute.xlu1 %755 }
 0x183   : > { %v764_v60 = vmul.f32 %v756_v53, %v729_v55 }
 0x184   : > { %v947_v14 = vadd.f32 %v2046_v54, %v933_v16 }
 0x185   : > { %v771_v17 = vadd.f32 %v764_v60, %v721_v15 }
 0x186   : > { %v954_v9 = vmax.f32 %v947_v14, 0.0 }
 0x187   : > { %v806_v11 = vpop.permute.xlu1 %805 }
 0x188   : > { %1440 = vmatmul.mubr.msk.f32.gmra.mrb[8].mxu0 %vm965_vm1, %v954_v9  ;;  %v814_v8 = vmul.f32 %v806_v11, %v779_v44  ;;  %v1369_v11 = vld [vmem:[%s2254_s9] ss:$0 sm:$0xff] }
 0x189   : > { %1442 = vmatprep.mubr.msk.f32.mxu0 %vm1699_vm0, %v1700_v30 }
 0x18a   : > { %v821_v22 = vadd.f32 %v814_v8, %v771_v17 }
 0x18c   : > { %v902_v18 = vpop.permute.xlu1 %901  ;;  %v871_v20 = vadd.f32 %v864_v23, %v821_v22 }
 0x18d   : > { %v913_v7 = vmul.f32 %v902_v18, %v878_v10 }
 0x18f   : > { %v920_v27 = vadd.f32 %v913_v7, %v870_v21 }
 0x190   : > { %v906_v19 = vpop.permute.xlu1 %905 }
 0x191   : > { %v934_v28 = vmul.f32 %v2041_v34, %v920_v27  ;;  %v914_v29 = vmul.f32 %v906_v19, %v879_v26 }
 0x193   : > { %v948_v31 = vadd.f32 %v2046_v54, %v934_v28  ;;  %v921_v33 = vadd.f32 %v914_v29, %v871_v20 }
 0x195   : > { %v955_v1 = vmax.f32 %v948_v31, 0.0  ;;  %v935_v24 = vmul.f32 %v2041_v34, %v921_v33  ;;  %v1368_v34 = vld [vmem:[%s2252_s7] ss:$0 sm:$0xff] }
 0x197   : > { %v949_v36 = vadd.f32 %v2046_v54, %v935_v24  ;;  %1443 = vmatmul.mubr.msk.f32.gmra.mrb[10].mxu0 %vm965_vm1, %v955_v1 }
 0x198   : > { %1445 = vmatprep.mubr.msk.f32.mxu0 %vm1699_vm0, %v1700_v30 }
 0x199   : > { %v956_v13 = vmax.f32 %v949_v36, 0.0 }
 0x19b   : > { %1446 = vmatmul.mubr.msk.f32.gmra.mrb[12].mxu0 %vm965_vm1, %v956_v13 }
 0x19c   : > { %1480 = vmatprep.mubr.msk.f32.mxu0 %vm1699_vm0, %v1700_v30 }
 0x1db   : > { %v1053_v40 = vpop.f32.mrb[0].mxu0 }
 0x1dc   : > { %v1094_v54 = vmul.f32 %v1367_v37, %v1053_v40  ;;  %v1429_v57 = vpop.f32.mrb[1].mxu0 }
 0x1de   : > { %v1108_v32 = vadd.f32 %v1368_v34, %v1094_v54 }
 0x1e0   : > { %v1115_v45 = vmax.f32 %v1108_v32, 0.0 }
 0x1e2   : > { %1481 = vmatmul.mubr.f32.vlgmr.msra.gmra.mrb[14].mxu0 %v1115_v45 }
 0x20b   : > { %v1058_v0 = vpop.f32.mrb[2].mxu0 }
 0x20c   : > { %v1095_v41 = vmul.f32 %v1367_v37, %v1058_v0  ;;  %v1432_v5 = vpop.f32.mrb[3].mxu0 }
 0x20e   : > { %v1109_v3 = vadd.f32 %v1368_v34, %v1095_v41 }
 0x210   : > { %v1116_v43 = vmax.f32 %v1109_v3, 0.0 }
 0x212   : > { %1484 = vmatmul.mubr.f32.vlgmr.msra.gmra.mrb[0].mxu1 %v1116_v43 }
 0x213   : > { %1486 = vmatprep.mubr.msk.f32.mxu1 %vm1699_vm0, %v1700_v30 }
 0x22e   : > { %v1063_v2 = vpop.f32.mrb[4].mxu0 }
 0x22f   : > { %v1096_v47 = vmul.f32 %v1367_v37, %v1063_v2  ;;  %v1435_v49 = vpop.f32.mrb[5].mxu0 }
 0x231   : > { %v1110_v6 = vadd.f32 %v1368_v34, %v1096_v47 }
 0x233   : > { %v1117_v42 = vmax.f32 %v1110_v6, 0.0 }
 0x235   : > { %1487 = vmatmul.mubr.f32.gmra.mrb[2].mxu1 %v1117_v42 }
 0x236   : > { %1489 = vmatprep.mubr.msk.f32.mxu1 %vm1699_vm0, %v1700_v30 }
 0x247   : > { %v1068_v50 = vpop.f32.mrb[6].mxu0 }
 0x248   : > { %v1097_v25 = vmul.f32 %v1367_v37, %v1068_v50  ;;  %v1438_v51 = vpop.f32.mrb[7].mxu0 }
 0x24a   : > { %v1111_v12 = vadd.f32 %v1368_v34, %v1097_v25 }
 0x24c   : > { %v1118_v52 = vmax.f32 %v1111_v12, 0.0 }
 0x24e   : > { %1490 = vmatmul.mubr.f32.gmra.mrb[4].mxu1 %v1118_v52 }
 0x24f   : > { %1492 = vmatprep.mubr.msk.f32.mxu1 %vm1699_vm0, %v1700_v30 }
 0x25b   : > { %v1073_v16 = vpop.f32.mrb[8].mxu0 }
 0x25c   : > { %v1098_v53 = vmul.f32 %v1367_v37, %v1073_v16  ;;  %v1441_v62 = vpop.f32.mrb[9].mxu0 }
 0x25e   : > { %v1112_v14 = vadd.f32 %v1368_v34, %v1098_v53 }
 0x260   : > { %v1119_v55 = vmax.f32 %v1112_v14, 0.0 }
 0x262   : > { %1493 = vmatmul.mubr.f32.gmra.mrb[6].mxu1 %v1119_v55 }
 0x263   : > { %1495 = vmatprep.mubr.msk.f32.mxu1 %vm1699_vm0, %v1700_v30 }
 0x26a   : > { %v1078_v56 = vpop.f32.mrb[10].mxu0 }
 0x26b   : > { %v1099_v58 = vmul.f32 %v1367_v37, %v1078_v56  ;;  %v1444_v46 = vpop.f32.mrb[11].mxu0 }
 0x26d   : > { %v1113_v4 = vadd.f32 %v1368_v34, %v1099_v58 }
 0x26e   : > { %v1083_v39 = vpop.f32.mrb[12].mxu0 }
 0x26f   : > { %v1120_v35 = vmax.f32 %v1113_v4, 0.0  ;;  %v1100_v9 = vmul.f32 %v1367_v37, %v1083_v39  ;;  %v1447_v44 = vpop.f32.mrb[13].mxu0 }
 0x271   : > { %v1114_v59 = vadd.f32 %v1368_v34, %v1100_v9  ;;  %1496 = vmatmul.mubr.f32.gmra.mrb[8].mxu1 %v1120_v35 }
 0x272   : > { %1498 = vmatprep.mubr.msk.f32.mxu1 %vm1699_vm0, %v1700_v30 }
 0x273   : > { %v1121_v60 = vmax.f32 %v1114_v59, 0.0 }
 0x275   : > { %1499 = vmatmul.mubr.f32.gmra.mrb[10].mxu1 %v1121_v60 }
 0x2b5   : > { %v1204_v63 = vpop.f32.mrb[14].mxu0 }
 0x2b6   : > { %v1245_v15 = vmul.f32 %v1369_v11, %v1204_v63  ;;  %v1482_v8 = vpop.f32.mrb[15].mxu0 }
 0x2b8   : > { %v1259_v38 = vadd.f32 %v1370_v48, %v1245_v15 }
 0x2ba   : > { %v1266_v30 = vmax.f32 %v1259_v38, 0.0 }
 0x2bc   : > { %1274 = vst.msk [vmem:[%s2227_s15] sm:$0xff] %vm1273_vm2, %v1266_v30 }
 0x2e5   : > { %v1209_v61 = vpop.f32.mrb[0].mxu1 }
 0x2e6   : > { %v1246_v10 = vmul.f32 %v1369_v11, %v1209_v61  ;;  %v1485_v17 = vpop.f32.mrb[1].mxu1 }
 0x2e8   : > { %v1260_v18 = vadd.f32 %v1370_v48, %v1246_v10 }
 0x2ea   : > { %v1267_v21 = vmax.f32 %v1260_v18, 0.0 }
 0x2ec   : > { %1275 = vst.msk [vmem:[%s2227_s15 + $0x8] sm:$0xff] %vm1273_vm2, %v1267_v21 }
 0x308   : > { %v1214_v22 = vpop.f32.mrb[2].mxu1 }
 0x309   : > { %v1247_v23 = vmul.f32 %v1369_v11, %v1214_v22  ;;  %v1488_v7 = vpop.f32.mrb[3].mxu1 }
 0x30b   : > { %v1261_v26 = vadd.f32 %v1370_v48, %v1247_v23 }
 0x30d   : > { %v1268_v27 = vmax.f32 %v1261_v26, 0.0 }
 0x30f   : > { %1276 = vst.msk [vmem:[%s2227_s15 + $0x10] sm:$0xff] %vm1273_vm2, %v1268_v27 }
 0x321   : > { %v1219_v19 = vpop.f32.mrb[4].mxu1 }
 0x322   : > { %v1248_v20 = vmul.f32 %v1369_v11, %v1219_v19  ;;  %v1491_v28 = vpop.f32.mrb[5].mxu1 }
 0x324   : > { %v1262_v29 = vadd.f32 %v1370_v48, %v1248_v20 }
 0x326   : > { %v1269_v31 = vmax.f32 %v1262_v29, 0.0 }
 0x328   : > { %1277 = vst.msk [vmem:[%s2227_s15 + $0x18] sm:$0xff] %vm1273_vm2, %v1269_v31 }
 0x335   : > { %v1224_v33 = vpop.f32.mrb[6].mxu1 }
 0x336   : > { %v1249_v1 = vmul.f32 %v1369_v11, %v1224_v33  ;;  %v1494_v24 = vpop.f32.mrb[7].mxu1 }
 0x338   : > { %v1263_v36 = vadd.f32 %v1370_v48, %v1249_v1 }
 0x33a   : > { %v1270_v13 = vmax.f32 %v1263_v36, 0.0 }
 0x33c   : > { %1278 = vst.msk [vmem:[%s2227_s15 + $0x20] sm:$0xff] %vm1273_vm2, %v1270_v13 }
 0x344   : > { %v1229_v37 = vpop.f32.mrb[8].mxu1 }
 0x345   : > { %v1250_v40 = vmul.f32 %v1369_v11, %v1229_v37  ;;  %v1497_v34 = vpop.f32.mrb[9].mxu1 }
 0x347   : > { %v1264_v54 = vadd.f32 %v1370_v48, %v1250_v40 }
 0x348   : > { %v1234_v57 = vpop.f32.mrb[10].mxu1 }
 0x349   : > { %v1271_v32 = vmax.f32 %v1264_v54, 0.0  ;;  %v1251_v45 = vmul.f32 %v1369_v11, %v1234_v57  ;;  %v1500_v0 = vpop.f32.mrb[11].mxu1 }
 0x34b   : > { %1279 = vst.msk [vmem:[%s2227_s15 + $0x28] sm:$0xff] %vm1273_vm2, %v1271_v32  ;;  %v1265_v41 = vadd.f32 %v1370_v48, %v1251_v45 }
 0x34d   : > { %v1272_v5 = vmax.f32 %v1265_v41, 0.0 }
 0x34f   : > { %1281 = vst.msk [vmem:[%s2227_s15 + $0x30] sm:$0x1] %vm1280_vm3, %v1272_v5 }
 0x350 PF: > { %s22_s17 = sadd.s32 1, %s1683_s17  }
 0x351   : > { %p19_p3 = scmp.ge.s32.totalorder %s22_s17, 4  }
 0x353   :  { %21 = sbr.rel (!%p19_p3) target bundleno = 1 (0x1), region = 108 }
 0x35a   :  { %1303 = vsyncpa [#allocation3], 1 }
 0x35b   :  { %1305 = vsyncpa [#allocation3 + $0x1], 1 }

</bundles_post_ra>
